<compile_context>
chip_gen: v7x
topology: tpu7x:2x2x1
jax: 0.10.0
libtpu: 0.0.40
codegen_flags: <defaults>
</compile_context>

<pallas_src>
import jax
import jax.numpy as jnp
from jax.experimental import pallas as pl
from jax.experimental.pallas import tpu as pltpu


# Finite "-inf" used for padded vocab columns (avoids inf-inf NaN hazards).
_NEG_FILL = float(jnp.finfo(jnp.float32).min) / 2


def _round_up(x, m):
    return (x + m - 1) // m * m


def _vmem_capacity_bytes():
    """Physical per-core VMEM capacity (generation-aware), with safe fallbacks."""
    try:
        cap = int(pltpu.get_tpu_info().vmem_capacity_bytes)
        if cap > 0:
            return cap
    except Exception:
        pass
    try:
        kind = jax.devices()[0].device_kind.lower()
        if "v5" in kind or "v6" in kind:
            return 128 << 20
    except Exception:
        pass
    return 64 << 20  # conservative (v7x per-TensorCore)


def _proj_logits_lse_kernel(x_ref, w_ref, b_ref, logits_ref, lse_ref, m_ref, l_ref):
    # x_ref: (tm, D) mxu dtype | w_ref: (D, tv) mxu dtype | b_ref: (1, tv) f32
    # logits_ref: (tm, tv) per-tile output (indexed (i, j) -> pipelined writeback)
    # lse_ref:    (tm, 1) f32 logsumexp output, resident across the vocab axis
    # m_ref, l_ref: (tm, 1) f32 running max / running sum of exp (scratch)
    j = pl.program_id(1)
    nj = pl.num_programs(1)

    @pl.when(j == 0)
    def _():
        m_ref[...] = jnp.full(m_ref.shape, _NEG_FILL, m_ref.dtype)
        l_ref[...] = jnp.zeros(l_ref.shape, l_ref.dtype)

    # MXU matmul with f32 accumulation; bias already f32 (cast hoisted to wrapper).
    logits = jnp.dot(x_ref[...], w_ref[...],
                     preferred_element_type=jnp.float32) + b_ref[...]
    logits_ref[...] = logits.astype(logits_ref.dtype)

    # Online logsumexp update.
    m_prev = m_ref[...]
    m_new = jnp.maximum(m_prev, jnp.max(logits, axis=-1, keepdims=True))
    l_ref[...] = (l_ref[...] * jnp.exp(m_prev - m_new)
                  + jnp.sum(jnp.exp(logits - m_new), axis=-1, keepdims=True))
    m_ref[...] = m_new

    @pl.when(j == nj - 1)
    def _():
        lse_ref[...] = m_ref[...] + jnp.log(l_ref[...])


def _normalize_kernel(logits_ref, lse_ref, o_ref):
    # Cheap streaming elementwise pass: log_probs = logits - logsumexp.
    o_ref[...] = (logits_ref[...].astype(jnp.float32) - lse_ref[...]).astype(o_ref.dtype)


def _choose_tiles(M, d_model, vocab, mxu_bytes, logits_bytes, vmem_cap):
    budget = int(vmem_cap * 0.70)  # leave compiler / internal-scratch headroom

    # Vocab tile: (d_model, tv) weight block, double-buffered. Multiples of 256
    # (matches the 2x256 MXU on v6e/v7x), capped by ~1/3 of the budget.
    w_budget = min(budget // 3, 32 << 20)
    tv = (w_budget // (2 * d_model * mxu_bytes)) // 256 * 256
    tv = max(256, min(2048, tv))
    tv = min(tv, _round_up(vocab, 128))        # never wider than the padded vocab
    tv = max(128, tv // 128 * 128)

    # Row tile: (tm, d_model) activation + (tm, tv) logits output, double-buffered,
    # from what's left. tm is independent of the full vocab size (two-pass design).
    remaining = budget - 2 * d_model * tv * mxu_bytes
    per_row = 2 * d_model * mxu_bytes + 2 * tv * logits_bytes + 4 * 128 * 4
    tm = max(8, min(512, (remaining // per_row) // 8 * 8))
    tm = min(tm, _round_up(M, 8))

    # Megacore (v7x: 64 MiB VMEM, 2 TensorCores): prefer >= 2 row tiles so the
    # "parallel" i axis shards across cores, but never drop below 256 rows.
    if vmem_cap <= (64 << 20) and M >= 512 and _round_up(M, tm) // tm < 2:
        tm = min(512, max(256, _round_up((M + 1) // 2, 8)))

    return tm, tv


def projection_layer(x, weight_t, bias, *,
                     mxu_dtype=jnp.bfloat16, out_dtype=jnp.float32,
                     logits_dtype=None, tm=None, tv=None):
    """
    Fused Linear(d_model, vocab_size) + log_softmax(dim=-1), two Pallas passes.

    x:        (batch, seq, d_model)
    weight_t: (d_model, vocab)  -- transpose of the PyTorch Linear weight
    bias:     (vocab,)
    returns:  (batch, seq, vocab) log-probabilities in `out_dtype` (f32 default;
              pass out_dtype/logits_dtype=jnp.bfloat16 to halve the M*V HBM traffic
              at ~1e-2 absolute log-prob error).
    """
    batch, seq, d_model = x.shape
    vocab = weight_t.shape[1]
    M = batch * seq

    logits_dtype = out_dtype if logits_dtype is None else logits_dtype
    mxu_bytes = jnp.dtype(mxu_dtype).itemsize
    logits_bytes = jnp.dtype(logits_dtype).itemsize
    out_bytes = jnp.dtype(out_dtype).itemsize

    vmem_cap = _vmem_capacity_bytes()
    tm_auto, tv_auto = _choose_tiles(M, d_model, vocab, mxu_bytes, logits_bytes, vmem_cap)

    def _footprint(tm_, tv_):
        return (2 * tm_ * d_model * mxu_bytes      # x tile (double-buffered)
                + 2 * d_model * tv_ * mxu_bytes    # weight tile
                + 2 * 8 * tv_ * 4                  # bias tile (sublane-padded)
                + 2 * tm_ * tv_ * logits_bytes     # logits output tile
                + 2 * tm_ * 128 * 4                # lse output (lane-padded)
                + 2 * tm_ * 128 * 4)               # m / l scratch (lane-padded)

    # Clamp / validate user-supplied tiles against physical VMEM.
    if tm is None:
        tm = tm_auto
    else:
        tm = max(8, min(_round_up(tm, 8), _round_up(M, 8)))
    if tv is None:
        tv = tv_auto
    else:
        tv = max(128, min(_round_up(tv, 128), _round_up(vocab, 128)))
    if _footprint(tm, tv) > vmem_cap - (8 << 20):
        tm, tv = tm_auto, tv_auto

    V_pad = _round_up(vocab, tv)
    M_pad = _round_up(M, tm)
    ni, nj = M_pad // tm, V_pad // tv
    grid = (ni, nj)

    # Pad instead of asserting divisibility; padded vocab columns get a huge
    # negative bias so they never affect max / sumexp; padded rows are sliced off.
    x2d = x.reshape(M, d_model).astype(mxu_dtype)
    if M_pad != M:
        x2d = jnp.pad(x2d, ((0, M_pad - M), (0, 0)))
    w = weight_t.astype(mxu_dtype)
    b = bias.astype(jnp.float32).reshape(1, vocab)
    if V_pad != vocab:
        w = jnp.pad(w, ((0, 0), (0, V_pad - vocab)))
        b = jnp.pad(b, ((0, 0), (0, V_pad - vocab)), constant_values=_NEG_FILL)

    vmem_limit1 = int(min(vmem_cap - (8 << 20),
                          max(_footprint(tm, tv) + (4 << 20), 16 << 20)))

    cost1 = pl.CostEstimate(
        flops=2 * M_pad * d_model * V_pad,
        transcendentals=M_pad * V_pad + M_pad,
        bytes_accessed=(M_pad * d_model * mxu_bytes          # x fetched once per row tile
                        + ni * d_model * V_pad * mxu_bytes   # weight streamed ni times
                        + ni * V_pad * 4                     # bias streamed ni times
                        + M_pad * V_pad * logits_bytes       # logits written once
                        + M_pad * 4),                        # logsumexp written once
    )

    logits, lse = pl.pallas_call(
        _proj_logits_lse_kernel,
        out_shape=(jax.ShapeDtypeStruct((M_pad, V_pad), logits_dtype),
                   jax.ShapeDtypeStruct((M_pad, 1), jnp.float32)),
        grid_spec=pltpu.PrefetchScalarGridSpec(
            num_scalar_prefetch=0,
            grid=grid,
            in_specs=[
                pl.BlockSpec((tm, d_model), lambda i, j: (i, 0)),   # x rows
                pl.BlockSpec((d_model, tv), lambda i, j: (0, j)),   # weight cols
                pl.BlockSpec((1, tv), lambda i, j: (0, j)),         # bias cols
            ],
            out_specs=[
                pl.BlockSpec((tm, tv), lambda i, j: (i, j)),        # per-tile logits
                pl.BlockSpec((tm, 1), lambda i, j: (i, 0)),         # logsumexp (resident)
            ],
            scratch_shapes=[
                pltpu.VMEM((tm, 1), jnp.float32),   # running max
                pltpu.VMEM((tm, 1), jnp.float32),   # running sum of exp
            ],
        ),
        compiler_params=pltpu.CompilerParams(
            dimension_semantics=("parallel", "arbitrary"),
            vmem_limit_bytes=vmem_limit1,
        ),
        cost_estimate=cost1,
    )(x2d, w, b)

    # Pass 2: lane-dense streaming normalize (no MXU work, both axes parallel).
    fp2 = 2 * tm * tv * logits_bytes + 2 * tm * 128 * 4 + 2 * tm * tv * out_bytes
    vmem_limit2 = int(min(vmem_cap - (8 << 20), max(fp2 + (4 << 20), 16 << 20)))

    cost2 = pl.CostEstimate(
        flops=M_pad * V_pad,
        transcendentals=0,
        bytes_accessed=(M_pad * V_pad * logits_bytes
                        + nj * M_pad * 4
                        + M_pad * V_pad * out_bytes),
    )

    out = pl.pallas_call(
        _normalize_kernel,
        out_shape=jax.ShapeDtypeStruct((M_pad, V_pad), out_dtype),
        grid_spec=pltpu.PrefetchScalarGridSpec(
            num_scalar_prefetch=0,
            grid=grid,
            in_specs=[
                pl.BlockSpec((tm, tv), lambda i, j: (i, j)),
                pl.BlockSpec((tm, 1), lambda i, j: (i, 0)),
            ],
            out_specs=pl.BlockSpec((tm, tv), lambda i, j: (i, j)),
        ),
        compiler_params=pltpu.CompilerParams(
            dimension_semantics=("parallel", "parallel"),
            vmem_limit_bytes=vmem_limit2,
        ),
        cost_estimate=cost2,
    )(logits, lse)

    return out[:M, :vocab].reshape(batch, seq, vocab)


if __name__ == "__main__":
    # Small shapes implied by the module: (batch, seq, d_model) -> (batch, seq, vocab)
    batch, seq, d_model, vocab = 2, 8, 32, 128

    key = jax.random.PRNGKey(0)
    kx, kw, kb = jax.random.split(key, 3)

    x = jax.random.normal(kx, (batch, seq, d_model), dtype=jnp.float32)

    # nn.Linear(d_model, vocab): W (vocab, d_model), b (vocab,), U(-1/sqrt d, 1/sqrt d)
    bound = 1.0 / (d_model ** 0.5)
    w = jax.random.uniform(kw, (vocab, d_model), jnp.float32, -bound, bound)
    b = jax.random.uniform(kb, (vocab,), jnp.float32, -bound, bound)

    out = projection_layer(x, w.T, b)   # default: bf16 MXU inputs, f32 log-probs
    out = jax.block_until_ready(out)

    # Reference with matched matmul precision (bf16 inputs, f32 accumulation).
    ref_logits = jnp.dot(x.astype(jnp.bfloat16), w.T.astype(jnp.bfloat16),
                         preferred_element_type=jnp.float32) + b
    ref = jax.nn.log_softmax(ref_logits, axis=-1)

    assert out.shape == (batch, seq, vocab)
    assert out.dtype == jnp.float32
    assert jnp.allclose(out, ref, atol=2e-3, rtol=2e-3)

    # Loose sanity check against the exact f32 reference (bf16 rounding only).
    ref32 = jax.nn.log_softmax(x @ w.T + b, axis=-1)
    assert jnp.allclose(out, ref32, atol=5e-2, rtol=0)

    print("KERNEL_OK")
</pallas_src>

<mosaic_0001>
module attributes {stable_mosaic.version = 11 : i64} {
  func.func @_proj_logits_lse_kernel(%arg0: i32, %arg1: i32, %arg2: memref<16x32xbf16, #tpu.memory_space<vmem>>, %arg3: memref<32x128xbf16, #tpu.memory_space<vmem>>, %arg4: memref<1x128xf32, #tpu.memory_space<vmem>>, %arg5: memref<16x128xf32, #tpu.memory_space<vmem>>, %arg6: memref<16x1xf32, #tpu.memory_space<vmem>>, %arg7: memref<16x1xf32, #tpu.memory_space<vmem>>, %arg8: memref<16x1xf32, #tpu.memory_space<vmem>>) attributes {dimension_semantics = [#tpu.dimension_semantics<parallel>, #tpu.dimension_semantics<arbitrary>], iteration_bounds = array<i64: 1, 1>, scalar_prefetch = 0 : i64, scratch_operands = 2 : i64, tpu.core_type = #tpu.core_type<tc>, window_params = [{transform_indices = @transform_0, window_bounds = array<i64: 16, 32>}, {transform_indices = @transform_1, window_bounds = array<i64: 32, 128>}, {transform_indices = @transform_2, window_bounds = array<i64: 1, 128>}, {transform_indices = @transform_3, window_bounds = array<i64: 16, 128>}, {transform_indices = @transform_4, window_bounds = array<i64: 16, 1>}]} {
    %c0_i32 = arith.constant 0 : i32
    %0 = arith.cmpi eq, %arg1, %c0_i32 : i32
    %1 = arith.extui %0 : i1 to i32
    %c0_i32_0 = arith.constant 0 : i32
    %2 = arith.cmpi ne, %1, %c0_i32_0 : i32
    scf.if %2 {
      %cst_20 = arith.constant -1.70141173E+38 : f32
      %29 = vector.broadcast %cst_20 : f32 to vector<16x1xf32>
      %c0_21 = arith.constant 0 : index
      %c0_22 = arith.constant 0 : index
      %30 = vector.load %arg7[%c0_21, %c0_22] : memref<16x1xf32, #tpu.memory_space<vmem>>, vector<16x1xf32>
      tpu.vector_store %arg7[%c0_21, %c0_22], %29 {strides = array<i32>} : memref<16x1xf32, #tpu.memory_space<vmem>>, vector<16x1xf32>,
      %cst_23 = arith.constant 0.000000e+00 : f32
      %31 = vector.broadcast %cst_23 : f32 to vector<16x1xf32>
      %c0_24 = arith.constant 0 : index
      %c0_25 = arith.constant 0 : index
      %32 = vector.load %arg8[%c0_24, %c0_25] : memref<16x1xf32, #tpu.memory_space<vmem>>, vector<16x1xf32>
      tpu.vector_store %arg8[%c0_24, %c0_25], %31 {strides = array<i32>} : memref<16x1xf32, #tpu.memory_space<vmem>>, vector<16x1xf32>,
    } else {
    }
    %c0 = arith.constant 0 : index
    %c0_1 = arith.constant 0 : index
    %3 = vector.load %arg2[%c0, %c0_1] : memref<16x32xbf16, #tpu.memory_space<vmem>>, vector<16x32xbf16>
    %c0_2 = arith.constant 0 : index
    %c0_3 = arith.constant 0 : index
    %4 = vector.load %arg3[%c0_2, %c0_3] : memref<32x128xbf16, #tpu.memory_space<vmem>>, vector<32x128xbf16>
    %cst = arith.constant dense<0.000000e+00> : vector<16x128xf32>
    %5 = tpu.matmul %3, %4, %cst {dimension_numbers = #tpu.dot_dimension_numbers<[1], [0], [0], [1], [0, 0, 1, 1], [], []>} : vector<16x32xbf16>, vector<32x128xbf16>, vector<16x128xf32> -> vector<16x128xf32>
    %c0_4 = arith.constant 0 : index
    %c0_5 = arith.constant 0 : index
    %6 = vector.load %arg4[%c0_4, %c0_5] : memref<1x128xf32, #tpu.memory_space<vmem>>, vector<1x128xf32>
    %7 = vector.broadcast %6 : vector<1x128xf32> to vector<16x128xf32>
    %8 = arith.addf %5, %7 : vector<16x128xf32>
    %c0_6 = arith.constant 0 : index
    %c0_7 = arith.constant 0 : index
    %9 = vector.load %arg5[%c0_6, %c0_7] : memref<16x128xf32, #tpu.memory_space<vmem>>, vector<16x128xf32>
    tpu.vector_store %arg5[%c0_6, %c0_7], %8 {strides = array<i32>} : memref<16x128xf32, #tpu.memory_space<vmem>>, vector<16x128xf32>,
    %c0_8 = arith.constant 0 : index
    %c0_9 = arith.constant 0 : index
    %10 = vector.load %arg7[%c0_8, %c0_9] : memref<16x1xf32, #tpu.memory_space<vmem>>, vector<16x1xf32>
    %cst_10 = arith.constant dense<0xFF800000> : vector<16xf32>
    %11 = vector.multi_reduction <maximumf>, %8, %cst_10 [1] : vector<16x128xf32> to vector<16xf32>
    %12 = vector.shape_cast %11 : vector<16xf32> to vector<16x1xf32>
    %13 = arith.maximumf %10, %12 : vector<16x1xf32>
    %c0_11 = arith.constant 0 : index
    %c0_12 = arith.constant 0 : index
    %14 = vector.load %arg8[%c0_11, %c0_12] : memref<16x1xf32, #tpu.memory_space<vmem>>, vector<16x1xf32>
    %15 = arith.subf %10, %13 : vector<16x1xf32>
    %16 = math.exp %15 : vector<16x1xf32>
    %17 = arith.mulf %14, %16 : vector<16x1xf32>
    %18 = vector.broadcast %13 : vector<16x1xf32> to vector<16x128xf32>
    %19 = arith.subf %8, %18 : vector<16x128xf32>
    %20 = math.exp %19 : vector<16x128xf32>
    %cst_13 = arith.constant dense<0.000000e+00> : vector<16xf32>
    %21 = vector.multi_reduction <add>, %20, %cst_13 [1] : vector<16x128xf32> to vector<16xf32>
    %22 = vector.shape_cast %21 : vector<16xf32> to vector<16x1xf32>
    %23 = arith.addf %17, %22 : vector<16x1xf32>
    %c0_14 = arith.constant 0 : index
    %c0_15 = arith.constant 0 : index
    %24 = vector.load %arg8[%c0_14, %c0_15] : memref<16x1xf32, #tpu.memory_space<vmem>>, vector<16x1xf32>
    tpu.vector_store %arg8[%c0_14, %c0_15], %23 {strides = array<i32>} : memref<16x1xf32, #tpu.memory_space<vmem>>, vector<16x1xf32>,
    %c0_16 = arith.constant 0 : index
    %c0_17 = arith.constant 0 : index
    %25 = vector.load %arg7[%c0_16, %c0_17] : memref<16x1xf32, #tpu.memory_space<vmem>>, vector<16x1xf32>
    tpu.vector_store %arg7[%c0_16, %c0_17], %13 {strides = array<i32>} : memref<16x1xf32, #tpu.memory_space<vmem>>, vector<16x1xf32>,
    %c0_i32_18 = arith.constant 0 : i32
    %26 = arith.cmpi eq, %arg1, %c0_i32_18 : i32
    %27 = arith.extui %26 : i1 to i32
    %c0_i32_19 = arith.constant 0 : i32
    %28 = arith.cmpi ne, %27, %c0_i32_19 : i32
    scf.if %28 {
      %c0_20 = arith.constant 0 : index
      %c0_21 = arith.constant 0 : index
      %29 = vector.load %arg7[%c0_20, %c0_21] : memref<16x1xf32, #tpu.memory_space<vmem>>, vector<16x1xf32>
      %c0_22 = arith.constant 0 : index
      %c0_23 = arith.constant 0 : index
      %30 = vector.load %arg8[%c0_22, %c0_23] : memref<16x1xf32, #tpu.memory_space<vmem>>, vector<16x1xf32>
      %31 = math.log %30 : vector<16x1xf32>
      %32 = arith.addf %29, %31 : vector<16x1xf32>
      %c0_24 = arith.constant 0 : index
      %c0_25 = arith.constant 0 : index
      %33 = vector.load %arg6[%c0_24, %c0_25] : memref<16x1xf32, #tpu.memory_space<vmem>>, vector<16x1xf32>
      tpu.vector_store %arg6[%c0_24, %c0_25], %32 {strides = array<i32>} : memref<16x1xf32, #tpu.memory_space<vmem>>, vector<16x1xf32>,
    } else {
    }
    return
  }
  func.func @transform_0(%arg0: i32, %arg1: i32) -> (i32, i32) {
    %c0_i32 = arith.constant 0 : i32
    %c0_i32_0 = arith.constant 0 : i32
    return %arg0, %c0_i32 : i32, i32
  }
  func.func @transform_1(%arg0: i32, %arg1: i32) -> (i32, i32) {
    %c0_i32 = arith.constant 0 : i32
    %c0_i32_0 = arith.constant 0 : i32
    return %c0_i32, %arg1 : i32, i32
  }
  func.func @transform_2(%arg0: i32, %arg1: i32) -> (i32, i32) {
    %c0_i32 = arith.constant 0 : i32
    %c0_i32_0 = arith.constant 0 : i32
    return %c0_i32, %arg1 : i32, i32
  }
  func.func @transform_3(%arg0: i32, %arg1: i32) -> (i32, i32) {
    %c0_i32 = arith.constant 0 : i32
    return %arg0, %arg1 : i32, i32
  }
  func.func @transform_4(%arg0: i32, %arg1: i32) -> (i32, i32) {
    %c0_i32 = arith.constant 0 : i32
    %c0_i32_0 = arith.constant 0 : i32
    return %arg0, %c0_i32 : i32, i32
  }
}

</mosaic_0001>

<bundles_post_ra>
// kernel: tpu_custom_call.1
= control target key start
LH: loop header
LB: loop body
LE: loop exit
PB: predicated region body
PF: predicated region fallthrough
CT: control target
= control target key end

     0   :  { %10 = vsyncpa [#allocation5], 0  ;;  %s421_s0 = inlined_call_operand.hbm [shape: bf16[16,32], index: 0, kind: input, shape index: {}]   ;;  %s422_s1 = inlined_call_operand.hbm [shape: bf16[32,128], index: 1, kind: input, shape index: {}]   ;;  %s423_s2 = inlined_call_operand.vmem [shape: f32[1,128], index: 2, kind: input, shape index: {}]   ;;  %s424_s3 = inlined_call_operand.hbm [shape: f32[16,128], index: 3, kind: output, shape index: {0}]   ;;  %s425_s4 = inlined_call_operand.vmem [shape: f32[16,1], index: 4, kind: output, shape index: {1}]  }
   0x1   :  { %11 = vsyncpa [#allocation8], 0 }
   0x2   :  { %12 = vsyncpa [#allocation6], 0  ;;  %s330_s15 = smov [#allocation4]   ;;  %s258_s19 = scalar_lea.hbm %s421_s0, 128 }
   0x3   :  { %s18_s16 = sshll.u32 %s330_s15, 4  ;;  %p259_p0 = scmp.ne.s32.totalorder %s421_s0, %s258_s19  ;;  %s19_s16 = int_to_ptr.vmem [resolvable:$true] %s18_s16 }
   0x4   :  { %p262_p1 = scmp.lt.u32.totalorder %s258_s19, %s421_s0 }
   0x6   :  { %p264_p2 = pnand %p262_p1, %p259_p0 }
   0x8   :  { %267 = shalt.err (!%p264_p2)
}
   0x9   :  { %s268_s24 = scalar_lea.vmem %s19_s16, 128  ;;  %p273_p4 = scmp.lt.s32.totalorder %s19_s16, %s19_s16 }
   0xa   :  { %p269_p3 = scmp.ne.s32.totalorder %s19_s16, %s268_s24  ;;  %p274_p5 = scmp.lt.s32.totalorder %s268_s24, %s268_s24 }
   0xc   :  { %p275_p6 = por %p274_p5, %p273_p4 }
   0xe   :  { %p276_p7 = pnand %p275_p6, %p269_p3 }
  0x10   :  { %279 = shalt.err (!%p276_p7)
}
  0x11   :  { %s331_s25 = smov 64   ;;  %s332_s26 = smov 4  }
  0x12   :  { %24 = dma.hbm_to_vmem [thread:$0]  %s421_s0, 128, %s19_s16, [#allocation5], %s331_s25, %s331_s25, %s332_s26  }
  0x13   :  { %s333_s29 = smov [#allocation7]   ;;  %s280_s7 = scalar_lea.hbm %s422_s1, 256 }
  0x14   :  { %s30_s30 = sshll.u32 %s333_s29, 4  ;;  %p281_p8 = scmp.ne.s32.totalorder %s422_s1, %s280_s7  ;;  %s31_s30 = int_to_ptr.vmem [resolvable:$true] %s30_s30 }
  0x15   :  { %p284_p9 = scmp.lt.u32.totalorder %s280_s7, %s422_s1 }
  0x17   :  { %p286_p10 = pnand %p284_p9, %p281_p8 }
  0x19   :  { %289 = shalt.err (!%p286_p10)
}
  0x1a   :  { %s290_s12 = scalar_lea.vmem %s31_s30, 256  ;;  %p295_p12 = scmp.lt.s32.totalorder %s31_s30, %s31_s30 }
  0x1b   :  { %p291_p11 = scmp.ne.s32.totalorder %s31_s30, %s290_s12  ;;  %p296_p13 = scmp.lt.s32.totalorder %s290_s12, %s290_s12 }
  0x1d   :  { %p297_p0 = por %p296_p13, %p295_p12 }
  0x1f   :  { %p298_p1 = pnand %p297_p0, %p291_p11 }
  0x21   :  { %301 = shalt.err (!%p298_p1)
}
  0x22   :  { %36 = dma.hbm_to_vmem [thread:$0]  %s422_s1, 256, %s31_s30, [#allocation8], %s331_s25, %s331_s25, %s332_s26  }
  0x23   :  { %324 = dma.done.wait [#allocation5], 128  }
  0x24   :  { %325 = vsyncadd [#allocation5], 4294967168 }
  0x25   :  { %326 = dma.done.wait [#allocation8], 256  }
  0x26   :  { %327 = vsyncadd [#allocation8], 4294967040  ;;  %vm50_vm0 = vcmask 7168   ;;  %v334_v0 = vmov 0.0   ;;  %vm335_vm1 = vmmov 0   ;;  %v243_v1 = vld [vmem:[#allocation7] sm:$0xff]  }
  0x27   :  { %53 = vst.msk [vmem:[#allocation3] sm:$0xff] %vm50_vm0, %v334_v0  ;;  %54 = vst.msk [vmem:[#allocation3 + $0x8] sm:$0xff] %vm50_vm0, %v334_v0  ;;  %222 = vmatprep.subr.bf16.mxu0 %v334_v0  ;;  %226 = vmatprep.mubr.msk.bf16.mxu0 %vm335_vm1, %v334_v0  ;;  %v244_v2 = vld [vmem:[#allocation7 + $0x8] sm:$0xff]   ;;  %v245_v3 = vld [vmem:[#allocation4] sm:$0xff]   ;;  %vm85_vm2 = vcmask 261120   ;;  %v337_v12 = vmov 0  }
  0x28   :  { %223 = vmatpush3.bf16.msra.mxu0 %v243_v1  ;;  %v336_v4 = vmov -1.7014117e+38   ;;  %v214_v5 = vld [vmem:[%s423_s2] ss:$0 sm:$0xff]  ;;  %241 = vset.pattern.permute.xlu1 %v337_v12  ;;  %s338_s2 = smov [#allocation9]  }
  0x29   :  { %224 = vmatprep.subr.bf16.mxu0 %v334_v0  ;;  %51 = vst.msk [vmem:[#allocation2] sm:$0xff] %vm50_vm0, %v336_v4  ;;  %52 = vst.msk [vmem:[#allocation2 + $0x8] sm:$0xff] %vm50_vm0, %v336_v4  ;;  %242 = vset.pattern.permute.xlu0 %v337_v12  ;;  %s197_s15 = sshll.u32 %s338_s2, 4  ;;  %s198_s15 = int_to_ptr.vmem [resolvable:$true] %s197_s15 }
  0x2a   :  { %s302_s16 = scalar_lea.vmem %s198_s15, 256  ;;  %p307_p3 = scmp.lt.s32.totalorder %s198_s15, %s198_s15 }
  0x2b   :  { %p303_p2 = scmp.ne.s32.totalorder %s198_s15, %s302_s16  ;;  %p308_p4 = scmp.lt.s32.totalorder %s302_s16, %s302_s16 }
  0x2c   :  { %225 = vmatpush3.bf16.msra.mxu0 %v244_v2 }
  0x2d   :  { %p309_p5 = por %p308_p4, %p307_p3 }
  0x2f   :  { %227 = vmatmul.mubr.msk.bf16.vlgmr.msra.gmra.mrb[0].mxu0 %vm85_vm2, %v245_v3  ;;  %p310_p6 = pnand %p309_p5, %p303_p2 }
  0x30   :  { %v132_v13 = vld [vmem:[#allocation2] sm:$0xff]  ;;  %v133_v16 = vld [vmem:[#allocation2 + $0x8] sm:$0xff] }
 0x102   :  { %v123_v6 = vpop.f32.mrb[0].mxu0 }
 0x103   :  { %v124_v7 = vadd.f32 %v214_v5, %v123_v6  ;;  %v228_v8 = vpop.f32.mrb[1].mxu0 }
 0x104   :  { %v126_v9 = vpop.f32.mrb[2].mxu0 }
 0x105   :  { %130 = vst [vmem:[#allocation9] sm:$0xff] %v124_v7  ;;  %v127_v10 = vadd.f32 %v214_v5, %v126_v9  ;;  %134 = vmax.xlane.f32.xlu0 %v124_v7  ;;  %v229_v11 = vpop.f32.mrb[3].mxu0 }
 0x107   :  { %131 = vst [vmem:[#allocation9 + $0x8] sm:$0xff] %v127_v10 }
 0x109   :  { %136 = vmax.xlane.f32.xlu0 %v127_v10 }
 0x192   :  { %v135_v14 = vpop.xlane.xlu0 %134 }
 0x193   :  { %v138_v15 = vmax.f32 %v132_v13, %v135_v14 }
 0x195   :  { %v142_v17 = vsub.f32 %v132_v13, %v138_v15  ;;  %175 = vst.msk [vmem:[#allocation2] sm:$0xff] %vm50_vm0, %v138_v15  ;;  %152 = vperm.xlu1 %241, %v138_v15  }
 0x196   :  { %v137_v18 = vpop.xlane.xlu0 %136 }
 0x197   :  { %v139_v19 = vmax.f32 %v133_v16, %v137_v18 }
 0x199   :  { %v143_v20 = vsub.f32 %v133_v16, %v139_v19  ;;  %176 = vst.msk [vmem:[#allocation2 + $0x8] sm:$0xff] %vm50_vm0, %v139_v19  ;;  %157 = vperm.xlu1 %241, %v139_v19  }
 0x214   :  { %v153_v21 = vpop.permute.xlu1 %152 }
 0x215   :  { %v160_v22 = vsub.f32 %v124_v7, %v153_v21 }
 0x217   :  { %v162_v23 = vmul.f32 1.442695, %v160_v22 }
 0x218   :  { %v158_v24 = vpop.permute.xlu1 %157 }
 0x219   :  { %246 = vpow2.f32 %v162_v23  ;;  %v161_v25 = vsub.f32 %v127_v10, %v158_v24 }
 0x21b   :  { %v164_v26 = vmul.f32 1.442695, %v161_v25 }
 0x21d   :  { %248 = vpow2.f32 %v164_v26 }
 0x223   :  { %v247_v27 = vpop.eup %246 }
 0x224   :  { %166 = vadd.xlane.f32.xlu0 %v247_v27 }
 0x227   :  { %v249_v28 = vpop.eup %248 }
 0x228   :  { %168 = vadd.xlane.f32.xlu1 %v249_v28 }
 0x229   :  { %313 = shalt.err (!%p310_p6)
}
 0x22a   :  { %s314_s19 = scalar_lea.hbm %s424_s3, 256 }
 0x22b   :  { %p315_p7 = scmp.ne.s32.totalorder %s424_s3, %s314_s19  ;;  %p318_p8 = scmp.lt.u32.totalorder %s314_s19, %s424_s3 }
 0x22d   :  { %p320_p9 = pnand %p318_p8, %p315_p7 }
 0x22f   :  { %323 = shalt.err (!%p320_p9)
}
 0x230   :  { %s339_s24 = smov 128   ;;  %s340_s25 = smov 8   ;;  %v144_v29 = vmul.f32 1.442695, %v142_v17  ;;  %v146_v30 = vmul.f32 1.442695, %v143_v20 }
 0x231   :  { %203 = dma.vmem_to_hbm [thread:$0]  %s198_s15, 256, %s424_s3, [#allocation6], %s339_s24, %s339_s24, %s340_s25   ;;  %v140_v32 = vld [vmem:[#allocation3] sm:$0xff]  ;;  %v141_v36 = vld [vmem:[#allocation3 + $0x8] sm:$0xff]  ;;  %v180_v45 = vld [vmem:[#allocation2] sm:$0xff] }
 0x232   :  { %250 = vpow2.f32 %v144_v29  ;;  %v181_v49 = vld [vmem:[#allocation2 + $0x8] sm:$0xff] }
 0x233   :  { %252 = vpow2.f32 %v146_v30 }
 0x23c   :  { %v251_v31 = vpop.eup %250 }
 0x23d   :  { %v148_v33 = vmul.f32 %v251_v31, %v140_v32  ;;  %v253_v34 = vpop.eup %252 }
 0x23e   :  { %v149_v38 = vmul.f32 %v253_v34, %v141_v36 }
 0x2b1   :  { %v167_v35 = vpop.xlane.xlu0 %166 }
 0x2b2   :  { %v170_v37 = vadd.f32 %v167_v35, %v148_v33 }
 0x2b4   :  { %173 = vst.msk [vmem:[#allocation3] sm:$0xff] %vm50_vm0, %v170_v37 }
 0x2b5   :  { %v169_v39 = vpop.xlane.xlu1 %168 }
 0x2b6   :  { %v171_v40 = vadd.f32 %v169_v39, %v149_v38 }
 0x2b8   :  { %174 = vst.msk [vmem:[#allocation3 + $0x8] sm:$0xff] %vm50_vm0, %v171_v40 }
 0x2bb   :  { %v182_v41 = vld [vmem:[#allocation3] sm:$0xff] }
 0x2bc   :  { %254 = vlog2.f32 %v182_v41 }
 0x2bf   :  { %v183_v42 = vld [vmem:[#allocation3 + $0x8] sm:$0xff] }
 0x2c0   :  { %256 = vlog2.f32 %v183_v42 }
 0x2c6   :  { %v255_v43 = vpop.eup %254 }
 0x2c7   :  { %v185_v44 = vmul.f32 0.6931472, %v255_v43 }
 0x2c9   :  { %v188_v46 = vadd.f32 %v185_v44, %v180_v45 }
 0x2ca   :  { %v257_v47 = vpop.eup %256 }
 0x2cb   :  { %190 = vst.msk [vmem:[%s425_s4] sm:$0xff] %vm50_vm0, %v188_v46  ;;  %v187_v48 = vmul.f32 0.6931472, %v257_v47 }
 0x2cd   :  { %v189_v50 = vadd.f32 %v187_v48, %v181_v49 }
 0x2cf   :  { %191 = vst.msk [vmem:[%s425_s4 + $0x8] sm:$0xff] %vm50_vm0, %v189_v50 }
 0x2d0   :  { %328 = dma.done.wait [#allocation6], 256  }
 0x2d1   :  { %329 = vsyncadd [#allocation6], 4294967040 }
 0x2d2   :  { %211 = vsyncpa [#allocation5], 1 }
 0x2d3   :  { %212 = vsyncpa [#allocation8], 1 }
 0x2d4   :  { %213 = vsyncpa [#allocation6], 1 }

</bundles_post_ra>
